<compile_context>
chip_gen: v7x
topology: tpu7x:2x2x1
jax: 0.10.0
libtpu: 0.0.40
codegen_flags: <defaults>
</compile_context>

<pallas_src>
import functools

import numpy as np
import jax
import jax.numpy as jnp
from jax.experimental import pallas as pl
from jax.experimental.pallas import tpu as pltpu

LANE = 128
_PW = 8   # sublane-aligned left-halo offset inside the scratch


def get_sobel_kernel(k=3):
    rng = np.linspace(-(k // 2), k // 2, k)
    x, y = np.meshgrid(rng, rng)
    num = x
    den = x ** 2 + y ** 2
    den[:, k // 2] = 1
    return num / den


def _si_sep3_kernel(x_ref, out_ref, xp_ref, *, H, W, BC, PW):
    """Separable k=3 path.  x_ref:(H,W,BC)  out_ref:(1,BC)  xp_ref:(H+2,W+2*PW,BC)."""
    Hp = H + 2

    # -- zero only the halo strips that are read (cols PW-1 / PW+W, rows 0 / H+1)
    zcol = jnp.zeros((Hp, 1, BC), jnp.float32)
    zrow = jnp.zeros((1, W, BC), jnp.float32)
    xp_ref[:, pl.ds(PW - 1, 1), :] = zcol
    xp_ref[:, pl.ds(PW + W, 1), :] = zcol
    xp_ref[pl.ds(0, 1), pl.ds(PW, W), :] = zrow
    xp_ref[pl.ds(H + 1, 1), pl.ds(PW, W), :] = zrow
    # -- tile-aligned interior copy (leading-dim offset 1, sublane offset PW=8)
    xp_ref[pl.ds(1, H), pl.ds(PW, W), :] = x_ref[...]

    # -- horizontal pass (sublane-shifted loads), integer weights
    xl = xp_ref[:, pl.ds(PW - 1, W), :]      # x[., j-1]  (zero padded)
    xc = xp_ref[:, pl.ds(PW, W), :]          # x[., j  ]
    xr = xp_ref[:, pl.ds(PW + 1, W), :]      # x[., j+1]
    dx = xr - xl                             # [-1, 0, 1] along W
    sx = (xl + xr) + (xc + xc)               # [ 1, 2, 1] along W

    # -- vertical pass (leading-dim slices are free)
    dm = dx[1:-1]
    gx2 = dx[:-2] + (dm + dm) + dx[2:]       # [1,2,1] along H   == 2*grad_x
    gy2 = sx[2:] - sx[:-2]                   # [-1,0,1] along H  == 2*grad_y

    t2 = gx2 * gx2 + gy2 * gy2               # 4 * value^2  (reused for both sums)
    v2 = jnp.sqrt(t2)                        # 2 * value    (EUP)

    # NOTE: could offload these two sums to the idle MXU via ones @ reshape(H*W, BC)
    # when W % 8 == 0; kept on the VPU (2 of ~13 ops/elem) for lowering safety.
    s2 = jnp.sum(t2, axis=(0, 1))            # per-lane (per-channel) reductions
    s1 = jnp.sum(v2, axis=(0, 1))

    inv = 1.0 / float(H * W)
    m2 = s2 * (0.25 * inv)                   # E[value^2]
    m1 = s1 * (0.5 * inv)                    # E[value]
    var = jnp.maximum(m2 - m1 * m1, 0.0)     # clamp tiny negative fp rounding
    out_ref[...] = jnp.sqrt(var).reshape(1, BC)


def _si_taps_kernel(x_ref, out_ref, xp_ref, *, H, W, K, BC, PW, KX, KY):
    """Generic-K fallback (non-separable kernels), same scratch layout."""
    p = K // 2
    Hp = H + 2 * p

    zcol = jnp.zeros((Hp, p, BC), jnp.float32)
    zrow = jnp.zeros((p, W, BC), jnp.float32)
    xp_ref[:, pl.ds(PW - p, p), :] = zcol
    xp_ref[:, pl.ds(PW + W, p), :] = zcol
    xp_ref[pl.ds(0, p), pl.ds(PW, W), :] = zrow
    xp_ref[pl.ds(H + p, p), pl.ds(PW, W), :] = zrow
    xp_ref[pl.ds(p, H), pl.ds(PW, W), :] = x_ref[...]

    gx = jnp.zeros((H, W, BC), jnp.float32)
    gy = jnp.zeros((H, W, BC), jnp.float32)
    for di in range(K):
        for dj in range(K):
            wx = KX[di][dj]
            wy = KY[di][dj]
            if wx == 0.0 and wy == 0.0:
                continue
            win = xp_ref[pl.ds(di, H), pl.ds(PW - p + dj, W), :]
            if wx != 0.0:
                gx = gx + wx * win
            if wy != 0.0:
                gy = gy + wy * win

    t = gx * gx + gy * gy
    v = jnp.sqrt(t)
    inv = 1.0 / float(H * W)
    m2 = jnp.sum(t, axis=(0, 1)) * inv
    m1 = jnp.sum(v, axis=(0, 1)) * inv
    var = jnp.maximum(m2 - m1 * m1, 0.0)
    out_ref[...] = jnp.sqrt(var).reshape(1, BC)


@functools.partial(jax.jit, static_argnames=("k_sobel",))
def si_forward(x, k_sobel=3):
    """x: (N, C, H, W) float32 (NCHW, like the PyTorch module). Returns (N, C)."""
    N, C, H, W = x.shape
    K = int(k_sobel)
    p = K // 2
    if p > _PW:
        raise NotImplementedError("k_sobel > 17 not supported")
    NC = N * C

    # Layout plumbing only: channels last so they map to lanes.
    xt = jnp.transpose(x.astype(jnp.float32), (2, 3, 0, 1)).reshape(H, W, NC)

    # ---- generation-aware VMEM budgeting ---------------------------------
    try:
        vmem_cap = int(pltpu.get_tpu_info().vmem_capacity_bytes)
    except Exception:                 # conservative fallback (v7x-sized VMEM)
        vmem_cap = 64 << 20
    vmem_limit = min(int(vmem_cap * 3) // 4, 100 << 20)
    budget = int(vmem_limit * 3) // 4

    Hp = H + 2 * p
    Wp = W + 2 * _PW
    # accounted per-channel bytes: halo scratch + double-buffered input block
    # + headroom for compiler-materialized elementwise temporaries.
    per_chan = 4 * (Hp * Wp + 2 * H * W + 6 * Hp * W)

    NC_lane = pl.cdiv(NC, LANE) * LANE
    bc_cap = max(LANE, (budget // per_chan) // LANE * LANE)
    BC = min(bc_cap, NC_lane)
    # keep >=2 grid steps when there are enough channels (v7x: 2 TensorCores).
    if NC_lane >= 2 * LANE:
        BC = min(BC, max(LANE, (NC_lane // 2) // LANE * LANE))
    NC_pad = pl.cdiv(NC, BC) * BC
    if NC_pad != NC:
        # extra zero channels produce std = 0 and are dropped after the call.
        xt = jnp.pad(xt, ((0, 0), (0, 0), (0, NC_pad - NC)))

    # make sure the scoped limit covers what we actually ask for (large images).
    accounted = per_chan * BC
    vmem_limit = min(int(vmem_cap * 9) // 10,
                     max(vmem_limit, accounted + accounted // 3))

    if K == 3:
        kernel = functools.partial(_si_sep3_kernel, H=H, W=W, BC=BC, PW=_PW)
    else:
        sob = get_sobel_kernel(K)
        kx = tuple(tuple(float(v) for v in row) for row in sob)
        ky = tuple(tuple(float(v) for v in row) for row in sob.T)
        kernel = functools.partial(_si_taps_kernel, H=H, W=W, K=K, BC=BC,
                                   PW=_PW, KX=kx, KY=ky)

    out = pl.pallas_call(
        kernel,
        out_shape=jax.ShapeDtypeStruct((1, NC_pad), jnp.float32),
        grid_spec=pltpu.PrefetchScalarGridSpec(
            num_scalar_prefetch=0,
            grid=(NC_pad // BC,),
            in_specs=[pl.BlockSpec((H, W, BC), lambda i: (0, 0, i))],
            out_specs=pl.BlockSpec((1, BC), lambda i: (0, i)),
            scratch_shapes=[pltpu.VMEM((Hp, Wp, BC), jnp.float32)],
        ),
        compiler_params=pltpu.CompilerParams(
            dimension_semantics=("parallel",),
            vmem_limit_bytes=int(vmem_limit),
        ),
    )(xt)

    return out.reshape(NC_pad)[:NC].reshape(N, C)


def _ref_si(x_np, kx, ky):
    """Pure-numpy reference mirroring the PyTorch forward."""
    N, C, H, W = x_np.shape
    K = kx.shape[0]
    p = K // 2
    xp = np.pad(x_np, ((0, 0), (0, 0), (p, p), (p, p)))
    gx = np.zeros_like(x_np)
    gy = np.zeros_like(x_np)
    for di in range(K):
        for dj in range(K):
            win = xp[:, :, di:di + H, dj:dj + W]
            gx += kx[di, dj] * win
            gy += ky[di, dj] * win
    v = np.sqrt(gx ** 2 + gy ** 2)
    denom = H * W
    var = (v ** 2).sum(axis=(2, 3)) / denom - (v.sum(axis=(2, 3)) / denom) ** 2
    return np.sqrt(var)


if __name__ == "__main__":
    # module config: SI(inp=C, k_sobel=3)
    N, C, H, W = 2, 4, 16, 16
    k_sobel = 3

    x = jax.random.normal(jax.random.PRNGKey(0), (N, C, H, W), dtype=jnp.float32)

    out = si_forward(x, k_sobel=k_sobel)
    out = jax.block_until_ready(out)

    sobel = get_sobel_kernel(k_sobel).astype(np.float64)
    ref = _ref_si(np.asarray(x, dtype=np.float32), sobel, sobel.T.copy())
    np.testing.assert_allclose(np.asarray(out), ref, rtol=1e-4, atol=1e-4)

    print("KERNEL_OK")
</pallas_src>

<mosaic_0001>
module attributes {stable_mosaic.version = 11 : i64} {
  func.func @_si_sep3_kernel(%arg0: i32, %arg1: memref<16x16x128xf32, #tpu.memory_space<vmem>>, %arg2: memref<1x128xf32, #tpu.memory_space<vmem>>, %arg3: memref<18x32x128xf32, #tpu.memory_space<vmem>>) attributes {dimension_semantics = [#tpu.dimension_semantics<parallel>], iteration_bounds = array<i64: 1>, scalar_prefetch = 0 : i64, scratch_operands = 1 : i64, tpu.core_type = #tpu.core_type<tc>, window_params = [{transform_indices = @transform_0, window_bounds = array<i64: 16, 16, 128>}, {transform_indices = @transform_1, window_bounds = array<i64: 1, 128>}]} {
    %cst = arith.constant 0.000000e+00 : f32
    %0 = vector.broadcast %cst : f32 to vector<18x1x128xf32>
    %cst_0 = arith.constant 0.000000e+00 : f32
    %1 = vector.broadcast %cst_0 : f32 to vector<1x16x128xf32>
    %c0 = arith.constant 0 : index
    %c7 = arith.constant 7 : index
    %c0_1 = arith.constant 0 : index
    %2 = vector.load %arg3[%c0, %c7, %c0_1] : memref<18x32x128xf32, #tpu.memory_space<vmem>>, vector<18x1x128xf32>
    tpu.vector_store %arg3[%c0, %c7, %c0_1], %0 {strides = array<i32>} : memref<18x32x128xf32, #tpu.memory_space<vmem>>, vector<18x1x128xf32>,
    %c0_2 = arith.constant 0 : index
    %c24 = arith.constant 24 : index
    %c0_3 = arith.constant 0 : index
    %3 = vector.load %arg3[%c0_2, %c24, %c0_3] : memref<18x32x128xf32, #tpu.memory_space<vmem>>, vector<18x1x128xf32>
    tpu.vector_store %arg3[%c0_2, %c24, %c0_3], %0 {strides = array<i32>} : memref<18x32x128xf32, #tpu.memory_space<vmem>>, vector<18x1x128xf32>,
    %c0_4 = arith.constant 0 : index
    %c8 = arith.constant 8 : index
    %c0_5 = arith.constant 0 : index
    %4 = vector.load %arg3[%c0_4, %c8, %c0_5] : memref<18x32x128xf32, #tpu.memory_space<vmem>>, vector<1x16x128xf32>
    tpu.vector_store %arg3[%c0_4, %c8, %c0_5], %1 {strides = array<i32>} : memref<18x32x128xf32, #tpu.memory_space<vmem>>, vector<1x16x128xf32>,
    %c17 = arith.constant 17 : index
    %c8_6 = arith.constant 8 : index
    %c0_7 = arith.constant 0 : index
    %5 = vector.load %arg3[%c17, %c8_6, %c0_7] : memref<18x32x128xf32, #tpu.memory_space<vmem>>, vector<1x16x128xf32>
    tpu.vector_store %arg3[%c17, %c8_6, %c0_7], %1 {strides = array<i32>} : memref<18x32x128xf32, #tpu.memory_space<vmem>>, vector<1x16x128xf32>,
    %c0_8 = arith.constant 0 : index
    %c0_9 = arith.constant 0 : index
    %c0_10 = arith.constant 0 : index
    %6 = vector.load %arg1[%c0_8, %c0_9, %c0_10] : memref<16x16x128xf32, #tpu.memory_space<vmem>>, vector<16x16x128xf32>
    %c1 = arith.constant 1 : index
    %c8_11 = arith.constant 8 : index
    %c0_12 = arith.constant 0 : index
    %7 = vector.load %arg3[%c1, %c8_11, %c0_12] : memref<18x32x128xf32, #tpu.memory_space<vmem>>, vector<16x16x128xf32>
    tpu.vector_store %arg3[%c1, %c8_11, %c0_12], %6 {strides = array<i32>} : memref<18x32x128xf32, #tpu.memory_space<vmem>>, vector<16x16x128xf32>,
    %c0_13 = arith.constant 0 : index
    %c7_14 = arith.constant 7 : index
    %c0_15 = arith.constant 0 : index
    %8 = vector.load %arg3[%c0_13, %c7_14, %c0_15] : memref<18x32x128xf32, #tpu.memory_space<vmem>>, vector<18x16x128xf32>
    %c0_16 = arith.constant 0 : index
    %c8_17 = arith.constant 8 : index
    %c0_18 = arith.constant 0 : index
    %9 = vector.load %arg3[%c0_16, %c8_17, %c0_18] : memref<18x32x128xf32, #tpu.memory_space<vmem>>, vector<18x16x128xf32>
    %c0_19 = arith.constant 0 : index
    %c9 = arith.constant 9 : index
    %c0_20 = arith.constant 0 : index
    %10 = vector.load %arg3[%c0_19, %c9, %c0_20] : memref<18x32x128xf32, #tpu.memory_space<vmem>>, vector<18x16x128xf32>
    %11 = arith.subf %10, %8 : vector<18x16x128xf32>
    %12 = arith.addf %8, %10 : vector<18x16x128xf32>
    %13 = arith.addf %9, %9 : vector<18x16x128xf32>
    %14 = arith.addf %12, %13 : vector<18x16x128xf32>
    %15 = vector.extract_strided_slice %11 {offsets = [1, 0, 0], sizes = [16, 16, 128], strides = [1, 1, 1]} : vector<18x16x128xf32> to vector<16x16x128xf32>
    %16 = vector.extract_strided_slice %11 {offsets = [0, 0, 0], sizes = [16, 16, 128], strides = [1, 1, 1]} : vector<18x16x128xf32> to vector<16x16x128xf32>
    %17 = arith.addf %15, %15 : vector<16x16x128xf32>
    %18 = arith.addf %16, %17 : vector<16x16x128xf32>
    %19 = vector.extract_strided_slice %11 {offsets = [2, 0, 0], sizes = [16, 16, 128], strides = [1, 1, 1]} : vector<18x16x128xf32> to vector<16x16x128xf32>
    %20 = arith.addf %18, %19 : vector<16x16x128xf32>
    %21 = vector.extract_strided_slice %14 {offsets = [2, 0, 0], sizes = [16, 16, 128], strides = [1, 1, 1]} : vector<18x16x128xf32> to vector<16x16x128xf32>
    %22 = vector.extract_strided_slice %14 {offsets = [0, 0, 0], sizes = [16, 16, 128], strides = [1, 1, 1]} : vector<18x16x128xf32> to vector<16x16x128xf32>
    %23 = arith.subf %21, %22 : vector<16x16x128xf32>
    %24 = arith.mulf %20, %20 : vector<16x16x128xf32>
    %25 = arith.mulf %23, %23 : vector<16x16x128xf32>
    %26 = arith.addf %24, %25 : vector<16x16x128xf32>
    %27 = math.sqrt %26 : vector<16x16x128xf32>
    %cst_21 = arith.constant dense<0.000000e+00> : vector<128xf32>
    %28 = vector.multi_reduction <add>, %26, %cst_21 [0, 1] : vector<16x16x128xf32> to vector<128xf32>
    %cst_22 = arith.constant dense<0.000000e+00> : vector<128xf32>
    %29 = vector.multi_reduction <add>, %27, %cst_22 [0, 1] : vector<16x16x128xf32> to vector<128xf32>
    %cst_23 = arith.constant 9.765625E-4 : f32
    %30 = vector.broadcast %cst_23 : f32 to vector<128xf32>
    %31 = arith.mulf %28, %30 : vector<128xf32>
    %cst_24 = arith.constant 0.001953125 : f32
    %32 = vector.broadcast %cst_24 : f32 to vector<128xf32>
    %33 = arith.mulf %29, %32 : vector<128xf32>
    %34 = arith.mulf %33, %33 : vector<128xf32>
    %35 = arith.subf %31, %34 : vector<128xf32>
    %cst_25 = arith.constant 0.000000e+00 : f32
    %36 = vector.broadcast %cst_25 : f32 to vector<128xf32>
    %37 = arith.maximumf %35, %36 : vector<128xf32>
    %38 = math.sqrt %37 : vector<128xf32>
    %39 = vector.shape_cast %38 : vector<128xf32> to vector<1x128xf32>
    %c0_26 = arith.constant 0 : index
    %c0_27 = arith.constant 0 : index
    %40 = vector.load %arg2[%c0_26, %c0_27] : memref<1x128xf32, #tpu.memory_space<vmem>>, vector<1x128xf32>
    tpu.vector_store %arg2[%c0_26, %c0_27], %39 {strides = array<i32>} : memref<1x128xf32, #tpu.memory_space<vmem>>, vector<1x128xf32>,
    return
  }
  func.func @transform_0(%arg0: i32) -> (i32, i32, i32) {
    %c0_i32 = arith.constant 0 : i32
    %c0_i32_0 = arith.constant 0 : i32
    %c0_i32_1 = arith.constant 0 : i32
    return %c0_i32, %c0_i32_0, %arg0 : i32, i32, i32
  }
  func.func @transform_1(%arg0: i32) -> (i32, i32) {
    %c0_i32 = arith.constant 0 : i32
    %c0_i32_0 = arith.constant 0 : i32
    return %c0_i32, %arg0 : i32, i32
  }
}

</mosaic_0001>

<bundles_post_ra>
// kernel: si_forward.1
= control target key start
LH: loop header
LB: loop body
LE: loop exit
PB: predicated region body
PF: predicated region fallthrough
CT: control target
= control target key end

     0   :  { %v972_v0 = vmov 0.0   ;;  %s1883_s0 = inlined_call_operand.vmem [shape: f32[16,16,128], index: 0, kind: input, shape index: {}]   ;;  %s1884_s1 = inlined_call_operand.vmem [shape: f32[1,128], index: 1, kind: output, shape index: {}]  }
   0x1   :  { %9 = vst [vmem:[#allocation2 + $0x27] sm:$0x1] %v972_v0  ;;  %8 = vst [vmem:[#allocation2 + $0x7] sm:$0x1] %v972_v0  ;;  %v49_v1 = vld [vmem:[%s1883_s0] sm:$0xff]  ;;  %v50_v2 = vld [vmem:[%s1883_s0 + $0x8] sm:$0xff] }
   0x2   :  { %10 = vst [vmem:[#allocation2 + $0x47] sm:$0x1] %v972_v0  ;;  %11 = vst [vmem:[#allocation2 + $0x67] sm:$0x1] %v972_v0  ;;  %v51_v3 = vld [vmem:[%s1883_s0 + $0x10] sm:$0xff]  ;;  %v52_v4 = vld [vmem:[%s1883_s0 + $0x18] sm:$0xff]  ;;  %v296_v27 = vadd.f32 %v49_v1, %v49_v1  ;;  %v297_v28 = vadd.f32 %v50_v2, %v50_v2 }
   0x3   :  { %12 = vst [vmem:[#allocation2 + $0x87] sm:$0x1] %v972_v0  ;;  %13 = vst [vmem:[#allocation2 + $0xa7] sm:$0x1] %v972_v0  ;;  %v53_v5 = vld [vmem:[%s1883_s0 + $0x20] sm:$0xff]  ;;  %v54_v6 = vld [vmem:[%s1883_s0 + $0x28] sm:$0xff]  ;;  %v298_v29 = vadd.f32 %v51_v3, %v51_v3  ;;  %v299_v35 = vadd.f32 %v52_v4, %v52_v4 }
   0x4   :  { %14 = vst [vmem:[#allocation2 + $0xc7] sm:$0x1] %v972_v0  ;;  %15 = vst [vmem:[#allocation2 + $0xe7] sm:$0x1] %v972_v0  ;;  %v55_v7 = vld [vmem:[%s1883_s0 + $0x30] sm:$0xff]  ;;  %v1007_v8 = vld [vmem:[%s1883_s0 + $0x38] sm:$0xff]  ;;  %v300_v36 = vadd.f32 %v53_v5, %v53_v5  ;;  %v301_v47 = vadd.f32 %v54_v6, %v54_v6 }
   0x5   :  { %16 = vst [vmem:[#allocation2 + $0x107] sm:$0x1] %v972_v0  ;;  %17 = vst [vmem:[#allocation2 + $0x127] sm:$0x1] %v972_v0  ;;  %v1012_v9 = vld [vmem:[%s1883_s0 + $0x40] sm:$0xff]  ;;  %v1019_v10 = vld [vmem:[%s1883_s0 + $0x48] sm:$0xff]  ;;  %v1088_v48 = vadd.f32 %v55_v7, %v55_v7 }
   0x6   :  { %18 = vst [vmem:[#allocation2 + $0x147] sm:$0x1] %v972_v0  ;;  %19 = vst [vmem:[#allocation2 + $0x167] sm:$0x1] %v972_v0  ;;  %v1024_v11 = vld [vmem:[%s1883_s0 + $0x50] sm:$0xff]  ;;  %v1029_v12 = vld [vmem:[%s1883_s0 + $0x58] sm:$0xff] }
   0x7   :  { %20 = vst [vmem:[#allocation2 + $0x187] sm:$0x1] %v972_v0  ;;  %21 = vst [vmem:[#allocation2 + $0x1a7] sm:$0x1] %v972_v0  ;;  %v1037_v13 = vld [vmem:[%s1883_s0 + $0x60] sm:$0xff]  ;;  %v1042_v14 = vld [vmem:[%s1883_s0 + $0x68] sm:$0xff] }
   0x8   :  { %22 = vst [vmem:[#allocation2 + $0x1c7] sm:$0x1] %v972_v0  ;;  %23 = vst [vmem:[#allocation2 + $0x1e7] sm:$0x1] %v972_v0  ;;  %v1047_v15 = vld [vmem:[%s1883_s0 + $0x70] sm:$0xff]  ;;  %v1055_v16 = vld [vmem:[%s1883_s0 + $0x78] sm:$0xff] }
   0x9   :  { %24 = vst [vmem:[#allocation2 + $0x207] sm:$0x1] %v972_v0  ;;  %25 = vst [vmem:[#allocation2 + $0x227] sm:$0x1] %v972_v0  ;;  %v1060_v17 = vld [vmem:[%s1883_s0 + $0x80] sm:$0xff]  ;;  %v1065_v18 = vld [vmem:[%s1883_s0 + $0x88] sm:$0xff] }
   0xa   :  { %26 = vst [vmem:[#allocation2 + $0x18] sm:$0x1] %v972_v0  ;;  %27 = vst [vmem:[#allocation2 + $0x38] sm:$0x1] %v972_v0  ;;  %v1073_v19 = vld [vmem:[%s1883_s0 + $0x90] sm:$0xff]  ;;  %v1078_v20 = vld [vmem:[%s1883_s0 + $0x98] sm:$0xff] }
   0xb   :  { %28 = vst [vmem:[#allocation2 + $0x58] sm:$0x1] %v972_v0  ;;  %29 = vst [vmem:[#allocation2 + $0x78] sm:$0x1] %v972_v0  ;;  %v1083_v21 = vld [vmem:[%s1883_s0 + $0xa0] sm:$0xff] }
   0xc   :  { %30 = vst [vmem:[#allocation2 + $0x98] sm:$0x1] %v972_v0  ;;  %31 = vst [vmem:[#allocation2 + $0xb8] sm:$0x1] %v972_v0 }
   0xd   :  { %32 = vst [vmem:[#allocation2 + $0xd8] sm:$0x1] %v972_v0  ;;  %33 = vst [vmem:[#allocation2 + $0xf8] sm:$0x1] %v972_v0 }
   0xe   :  { %34 = vst [vmem:[#allocation2 + $0x118] sm:$0x1] %v972_v0  ;;  %35 = vst [vmem:[#allocation2 + $0x138] sm:$0x1] %v972_v0 }
   0xf   :  { %36 = vst [vmem:[#allocation2 + $0x158] sm:$0x1] %v972_v0  ;;  %37 = vst [vmem:[#allocation2 + $0x178] sm:$0x1] %v972_v0 }
  0x10   :  { %38 = vst [vmem:[#allocation2 + $0x198] sm:$0x1] %v972_v0  ;;  %39 = vst [vmem:[#allocation2 + $0x1b8] sm:$0x1] %v972_v0 }
  0x11   :  { %40 = vst [vmem:[#allocation2 + $0x1d8] sm:$0x1] %v972_v0  ;;  %41 = vst [vmem:[#allocation2 + $0x1f8] sm:$0x1] %v972_v0 }
  0x12   :  { %42 = vst [vmem:[#allocation2 + $0x218] sm:$0x1] %v972_v0  ;;  %43 = vst [vmem:[#allocation2 + $0x238] sm:$0x1] %v972_v0 }
  0x13   :  { %44 = vst [vmem:[#allocation2 + $0x8] sm:$0xff] %v972_v0  ;;  %45 = vst [vmem:[#allocation2 + $0x10] sm:$0xff] %v972_v0 }
  0x14   :  { %47 = vst [vmem:[#allocation2 + $0x228] sm:$0xff] %v972_v0  ;;  %48 = vst [vmem:[#allocation2 + $0x230] sm:$0xff] %v972_v0 }
  0x15   :  { %82 = vst [vmem:[#allocation2 + $0x28] sm:$0xff] %v49_v1  ;;  %83 = vst [vmem:[#allocation2 + $0x30] sm:$0xff] %v50_v2 }
  0x16   :  { %84 = vst [vmem:[#allocation2 + $0x48] sm:$0xff] %v51_v3  ;;  %85 = vst [vmem:[#allocation2 + $0x50] sm:$0xff] %v52_v4 }
  0x17   :  { %86 = vst [vmem:[#allocation2 + $0x68] sm:$0xff] %v53_v5  ;;  %87 = vst [vmem:[#allocation2 + $0x70] sm:$0xff] %v54_v6 }
  0x18   :  { %88 = vst [vmem:[#allocation2 + $0x88] sm:$0xff] %v55_v7  ;;  %89 = vst [vmem:[#allocation2 + $0x90] sm:$0xff] %v1007_v8 }
  0x19   :  { %90 = vst [vmem:[#allocation2 + $0xa8] sm:$0xff] %v1012_v9  ;;  %91 = vst [vmem:[#allocation2 + $0xb0] sm:$0xff] %v1019_v10 }
  0x1a   :  { %92 = vst [vmem:[#allocation2 + $0xc8] sm:$0xff] %v1024_v11  ;;  %93 = vst [vmem:[#allocation2 + $0xd0] sm:$0xff] %v1029_v12  ;;  %v114_v22 = vld [vmem:[#allocation2 + $0x7] sm:$0xff]  ;;  %v115_v23 = vld [vmem:[#allocation2 + $0xf] sm:$0xff] }
  0x1b   :  { %94 = vst [vmem:[#allocation2 + $0xe8] sm:$0xff] %v1037_v13  ;;  %95 = vst [vmem:[#allocation2 + $0xf0] sm:$0xff] %v1042_v14  ;;  %v186_v24 = vld [vmem:[#allocation2 + $0x9] sm:$0xff]  ;;  %v187_v25 = vld [vmem:[#allocation2 + $0x11] sm:$0xff] }
  0x1c   :  { %96 = vst [vmem:[#allocation2 + $0x108] sm:$0xff] %v1047_v15  ;;  %97 = vst [vmem:[#allocation2 + $0x110] sm:$0xff] %v1055_v16  ;;  %v116_v26 = vld [vmem:[#allocation2 + $0x27] sm:$0xff]  ;;  %v258_v30 = vadd.f32 %v186_v24, %v114_v22  ;;  %v259_v31 = vadd.f32 %v187_v25, %v115_v23  ;;  %v117_v32 = vld [vmem:[#allocation2 + $0x2f] sm:$0xff]  ;;  %v222_v37 = vsub.f32 %v186_v24, %v114_v22 }
  0x1d   :  { %98 = vst [vmem:[#allocation2 + $0x128] sm:$0xff] %v1060_v17  ;;  %99 = vst [vmem:[#allocation2 + $0x130] sm:$0xff] %v1065_v18  ;;  %v188_v33 = vld [vmem:[#allocation2 + $0x29] sm:$0xff]  ;;  %v189_v34 = vld [vmem:[#allocation2 + $0x31] sm:$0xff]  ;;  %v223_v38 = vsub.f32 %v187_v25, %v115_v23 }
  0x1e   :  { %100 = vst [vmem:[#allocation2 + $0x148] sm:$0xff] %v1073_v19  ;;  %101 = vst [vmem:[#allocation2 + $0x150] sm:$0xff] %v1078_v20  ;;  %v224_v39 = vsub.f32 %v188_v33, %v116_v26  ;;  %v225_v40 = vsub.f32 %v189_v34, %v117_v32  ;;  %v118_v41 = vld [vmem:[#allocation2 + $0x47] sm:$0xff]  ;;  %v119_v42 = vld [vmem:[#allocation2 + $0x4f] sm:$0xff]  ;;  %v260_v44 = vadd.f32 %v188_v33, %v116_v26 }
  0x1f   :  { %102 = vst [vmem:[#allocation2 + $0x168] sm:$0xff] %v1083_v21  ;;  %v190_v43 = vld [vmem:[#allocation2 + $0x49] sm:$0xff]  ;;  %v261_v45 = vadd.f32 %v189_v34, %v117_v32  ;;  %v191_v46 = vld [vmem:[#allocation2 + $0x51] sm:$0xff] }
  0x20   :  { %v366_v49 = vadd.f32 %v224_v39, %v224_v39  ;;  %v367_v50 = vadd.f32 %v225_v40, %v225_v40  ;;  %v1090_v51 = vsub.f32 %v190_v43, %v118_v41  ;;  %v1092_v52 = vsub.f32 %v191_v46, %v119_v42  ;;  %v120_v53 = vld [vmem:[#allocation2 + $0x67] sm:$0xff]  ;;  %v121_v56 = vld [vmem:[#allocation2 + $0x6f] sm:$0xff] }
  0x21   :  { %v262_v54 = vadd.f32 %v190_v43, %v118_v41  ;;  %v263_v55 = vadd.f32 %v191_v46, %v119_v42  ;;  %v192_v57 = vld [vmem:[#allocation2 + $0x69] sm:$0xff]  ;;  %v193_v58 = vld [vmem:[#allocation2 + $0x71] sm:$0xff]  ;;  %v332_v59 = vadd.f32 %v296_v27, %v260_v44  ;;  %v333_v60 = vadd.f32 %v297_v28, %v261_v45 }
  0x22   :  { %v398_v61 = vadd.f32 %v366_v49, %v222_v37  ;;  %v399_v62 = vadd.f32 %v367_v50, %v223_v38  ;;  %v368_v1 = vadd.f32 %v1090_v51, %v1090_v51  ;;  %v369_v2 = vadd.f32 %v1092_v52, %v1092_v52  ;;  %v122_v37 = vld [vmem:[#allocation2 + $0x87] sm:$0xff]  ;;  %v195_v44 = vld [vmem:[#allocation2 + $0x91] sm:$0xff] }
  0x23   :  { %v1094_v63 = vadd.f32 %v298_v29, %v262_v54  ;;  %v1096_v0 = vadd.f32 %v299_v35, %v263_v55  ;;  %v264_v5 = vadd.f32 %v192_v57, %v120_v53  ;;  %v265_v6 = vadd.f32 %v193_v58, %v121_v56  ;;  %v194_v43 = vld [vmem:[#allocation2 + $0x89] sm:$0xff]  ;;  %v1153_v55 = vld [vmem:[%s1883_s0 + $0xc0] sm:$0xff] }
  0x24   :  { %v430_v3 = vadd.f32 %v398_v61, %v1090_v51  ;;  %v431_v4 = vadd.f32 %v399_v62, %v1092_v52  ;;  %v1106_v23 = vsub.f32 %v192_v57, %v120_v53  ;;  %v1108_v24 = vsub.f32 %v193_v58, %v121_v56  ;;  %v1140_v49 = vld [vmem:[%s1883_s0 + $0xb0] sm:$0xff]  ;;  %v1158_v56 = vld [vmem:[%s1883_s0 + $0xc8] sm:$0xff]  ;;  %106 = vst [vmem:[#allocation2 + $0x1a8] sm:$0xff] %v1153_v55 }
  0x25   :  { %v462_v7 = vsub.f32 %v1094_v63, %v258_v30  ;;  %v463_v22 = vsub.f32 %v1096_v0, %v259_v31  ;;  %v1110_v27 = vadd.f32 %v300_v36, %v264_v5  ;;  %v1112_v28 = vadd.f32 %v301_v47, %v265_v6  ;;  %104 = vst [vmem:[#allocation2 + $0x188] sm:$0xff] %v1140_v49  ;;  %v1213_v5 = vld [vmem:[%s1883_s0 + $0xf8] sm:$0xff] }
  0x26   :  { %v494_v25 = vmul.f32 %v430_v3, %v430_v3  ;;  %v495_v26 = vmul.f32 %v431_v4, %v431_v4  ;;  %v400_v33 = vadd.f32 %v368_v1, %v224_v39  ;;  %v401_v34 = vadd.f32 %v369_v2, %v225_v40  ;;  %v123_v40 = vld [vmem:[#allocation2 + $0x8f] sm:$0xff]  ;;  %107 = vst [vmem:[#allocation2 + $0x1b0] sm:$0xff] %v1158_v56 }
  0x27   :  { %v526_v29 = vmul.f32 %v462_v7, %v462_v7  ;;  %v527_v32 = vmul.f32 %v463_v22, %v463_v22  ;;  %v464_v35 = vsub.f32 %v1110_v27, %v332_v59  ;;  %v465_v30 = vsub.f32 %v1112_v28, %v333_v60  ;;  %v1177_v60 = vld [vmem:[%s1883_s0 + $0xd0] sm:$0xff]  ;;  %v1203_v3 = vld [vmem:[%s1883_s0 + $0xe8] sm:$0xff]  ;;  %113 = vst [vmem:[#allocation2 + $0x210] sm:$0xff] %v1213_v5 }
  0x28   :  { %v303_v31 = vadd.f32 %v1007_v8, %v1007_v8  ;;  %v1120_v38 = vadd.f32 %v1012_v9, %v1012_v9  ;;  %v432_v36 = vadd.f32 %v400_v33, %v1106_v23  ;;  %v433_v41 = vadd.f32 %v401_v34, %v1108_v24  ;;  %v1135_v9 = vld [vmem:[%s1883_s0 + $0xa8] sm:$0xff]  ;;  %108 = vst [vmem:[#allocation2 + $0x1c8] sm:$0xff] %v1177_v60  ;;  %v1208_v4 = vld [vmem:[%s1883_s0 + $0xf0] sm:$0xff] }
  0x29   :  { %v1124_v42 = vadd.f32 %v526_v29, %v494_v25  ;;  %v1126_v39 = vadd.f32 %v527_v32, %v495_v26  ;;  %v528_v45 = vmul.f32 %v464_v35, %v464_v35  ;;  %v266_v46 = vadd.f32 %v194_v43, %v122_v37  ;;  %103 = vst [vmem:[#allocation2 + $0x170] sm:$0xff] %v1135_v9 }
  0x2a   :  { %v267_v47 = vadd.f32 %v195_v44, %v123_v40  ;;  %v1130_v8 = vadd.f32 %v1019_v10, %v1019_v10  ;;  %v496_v50 = vmul.f32 %v432_v36, %v432_v36  ;;  %v497_v53 = vmul.f32 %v433_v41, %v433_v41  ;;  %v1148_v10 = vld [vmem:[%s1883_s0 + $0xb8] sm:$0xff]  ;;  %111 = vst [vmem:[#allocation2 + $0x1f0] sm:$0xff] %v1203_v3  ;;  %v125_v36 = vld [vmem:[#allocation2 + $0xaf] sm:$0xff] }
  0x2b   :  { %v529_v54 = vmul.f32 %v465_v30, %v465_v30  ;;  %906 = vrsqrt.f32 %v1124_v42  ;;  %v370_v57 = vadd.f32 %v1106_v23, %v1106_v23  ;;  %v1165_v58 = vadd.f32 %v1024_v11, %v1024_v11  ;;  %105 = vst [vmem:[#allocation2 + $0x190] sm:$0xff] %v1148_v10  ;;  %v1182_v11 = vld [vmem:[%s1883_s0 + $0xd8] sm:$0xff]  ;;  %112 = vst [vmem:[#allocation2 + $0x208] sm:$0xff] %v1208_v4  ;;  %v124_v30 = vld [vmem:[#allocation2 + $0xa7] sm:$0xff] }
  0x2c   :  { %908 = vrsqrt.f32 %v1126_v39  ;;  %v1169_v59 = vadd.f32 %v1029_v12, %v1029_v12  ;;  %v1187_v12 = vld [vmem:[%s1883_s0 + $0xe0] sm:$0xff]  ;;  %v371_v61 = vadd.f32 %v1108_v24, %v1108_v24  ;;  %v1191_v62 = vadd.f32 %v528_v45, %v496_v50  ;;  %109 = vst [vmem:[#allocation2 + $0x1d0] sm:$0xff] %v1182_v11 }
  0x2d   :  { %v1193_v1 = vadd.f32 %v529_v54, %v497_v53  ;;  %v1195_v2 = vsub.f32 %v194_v43, %v122_v37  ;;  %110 = vst [vmem:[#allocation2 + $0x1e8] sm:$0xff] %v1187_v12  ;;  %v814_v6 = vadd.f32 %v1126_v39, %v1124_v42  ;;  %v1217_v7 = vsub.f32 %v195_v44, %v123_v40  ;;  %v196_v37 = vld [vmem:[#allocation2 + $0xa9] sm:$0xff] }
  0x2e   :  { %v1220_v22 = vadd.f32 %v1088_v48, %v266_v46  ;;  %v1222_v25 = vadd.f32 %v303_v31, %v267_v47  ;;  %910 = vrsqrt.f32 %v1191_v62  ;;  %v1230_v26 = vadd.f32 %v1037_v13, %v1037_v13 }
  0x2f   :  { %v1234_v29 = vadd.f32 %v1042_v14, %v1042_v14  ;;  %v1238_v48 = vadd.f32 %v1047_v15, %v1047_v15  ;;  %912 = vrsqrt.f32 %v1193_v1  ;;  %v595_v32 = vand.u32 2147483648, %v1124_v42 }
  0x30   :  { %v1244_v33 = vadd.f32 %v1055_v16, %v1055_v16  ;;  %v1248_v13 = vadd.f32 %v1060_v17, %v1060_v17  ;;  %vm592_vm0 = vcmp.eq.f32.partialorder %v1124_v42, inf  ;;  %v602_v14 = vand.u32 2147483648, %v1126_v39 }
  0x31   :  { %v402_v34 = vadd.f32 %v370_v57, %v1090_v51  ;;  %v403_v15 = vadd.f32 %v371_v61, %v1092_v52  ;;  %v466_v35 = vsub.f32 %v1220_v22, %v1094_v63  ;;  %vm599_vm1 = vcmp.eq.f32.partialorder %v1126_v39, inf  ;;  %v197_v52 = vld [vmem:[#allocation2 + $0xb1] sm:$0xff] }
  0x32   :  { %v372_v16 = vadd.f32 %v1195_v2, %v1195_v2  ;;  %v373_v17 = vadd.f32 %v1217_v7, %v1217_v7  ;;  %v467_v31 = vsub.f32 %v1222_v25, %v1096_v0  ;;  %v815_v51 = vadd.f32 %v814_v6, %v1191_v62 }
  0x33   :  { %v434_v41 = vadd.f32 %v402_v34, %v1195_v2  ;;  %v435_v63 = vadd.f32 %v403_v15, %v1217_v7  ;;  %v530_v40 = vmul.f32 %v466_v35, %v466_v35  ;;  %v268_v43 = vadd.f32 %v196_v37, %v124_v30 }
  0x34   :  { %vm594_vm2 = vcmp.eq.f32.partialorder %v1124_v42, 0.0  ;;  %vm601_vm3 = vcmp.eq.f32.partialorder %v1126_v39, 0.0  ;;  %v531_v44 = vmul.f32 %v467_v31, %v467_v31  ;;  %v816_v45 = vadd.f32 %v815_v51, %v1193_v1 }
  0x35   :  { %v1269_v46 = vsub.f32 %v196_v37, %v124_v30  ;;  %v269_v0 = vadd.f32 %v197_v52, %v125_v36  ;;  %v907_v47 = vpop.eup %906  ;;  %v498_v50 = vmul.f32 %v434_v41, %v434_v41  ;;  %v499_v53 = vmul.f32 %v435_v63, %v435_v63 }
  0x36   :  { %v1271_v54 = vsub.f32 %v197_v52, %v125_v36  ;;  %v1274_v57 = vadd.f32 %v1120_v38, %v268_v43  ;;  %v909_v61 = vpop.eup %908  ;;  %v591_v6 = vmul.f32 %v907_v47, %v1124_v42  ;;  %v404_v15 = vadd.f32 %v372_v16, %v1106_v23 }
  0x37   :  { %v1278_v34 = vadd.f32 %v1130_v8, %v269_v0  ;;  %v405_v35 = vadd.f32 %v373_v17, %v1108_v24  ;;  %v1282_v30 = vadd.f32 %v530_v40, %v498_v50  ;;  %v1284_v37 = vadd.f32 %v531_v44, %v499_v53 }
  0x38   :  { %v598_v31 = vmul.f32 %v909_v61, %v1126_v39  ;;  %v468_v38 = vsub.f32 %v1274_v57, %v1110_v27  ;;  %vm606_vm4 = vcmp.eq.f32.partialorder %v1191_v62, inf  ;;  %v436_v51 = vadd.f32 %v404_v15, %v1269_v46  ;;  %v911_v16 = vpop.eup %910 }
  0x39   :  { %v437_v8 = vadd.f32 %v405_v35, %v1271_v54  ;;  %v469_v23 = vsub.f32 %v1278_v34, %v1112_v28  ;;  %vm608_vm5 = vcmp.eq.f32.partialorder %v1191_v62, 0.0  ;;  %v609_v24 = vand.u32 2147483648, %v1191_v62  ;;  %v913_v17 = vpop.eup %912 }
  0x3a   :  { %vm613_vm6 = vcmp.eq.f32.partialorder %v1193_v1, inf  ;;  %914 = vrsqrt.f32 %v1282_v30  ;;  %v605_v27 = vmul.f32 %v911_v16, %v1191_v62  ;;  %vm615_vm7 = vcmp.eq.f32.partialorder %v1193_v1, 0.0 }
  0x3b   :  { %916 = vrsqrt.f32 %v1284_v37  ;;  %v593_v28 = vsel %vm592_vm0, %v1124_v42, %v591_v6  ;;  %v612_v36 = vmul.f32 %v913_v17, %v1193_v1  ;;  %v616_v52 = vand.u32 2147483648, %v1193_v1 }
  0x3c   :  { %v600_v41 = vsel %vm599_vm1, %v1126_v39, %v598_v31  ;;  %v500_v63 = vmul.f32 %v436_v51, %v436_v51  ;;  %v374_v40 = vadd.f32 %v1269_v46, %v1269_v46  ;;  %v501_v43 = vmul.f32 %v437_v8, %v437_v8  ;;  %v198_v51 = vld [vmem:[#allocation2 + $0xc9] sm:$0xff]  ;;  %v199_v8 = vld [vmem:[#allocation2 + $0xd1] sm:$0xff] }
  0x3d   :  { %v532_v44 = vmul.f32 %v468_v38, %v468_v38  ;;  %v533_v0 = vmul.f32 %v469_v23, %v469_v23  ;;  %v607_v47 = vsel %vm606_vm4, %v1191_v62, %v605_v27  ;;  %v375_v50 = vadd.f32 %v1271_v54, %v1271_v54  ;;  %v126_v38 = vld [vmem:[#allocation2 + $0xc7] sm:$0xff] }
  0x3e   :  { %v596_v53 = vsel %vm594_vm2, %v595_v32, %v593_v28  ;;  %v603_v61 = vsel %vm601_vm3, %v602_v14, %v600_v41  ;;  %v614_v6 = vsel %vm613_vm6, %v1193_v1, %v612_v36  ;;  %v817_v31 = vadd.f32 %v816_v45, %v1282_v30  ;;  %v127_v14 = vld [vmem:[#allocation2 + $0xcf] sm:$0xff] }
  0x3f   :  { %v1327_v15 = vadd.f32 %v532_v44, %v500_v63  ;;  %v1329_v35 = vadd.f32 %v533_v0, %v501_v43  ;;  %vm620_vm8 = vcmp.eq.f32.partialorder %v1282_v30, inf  ;;  %vm622_vm9 = vcmp.eq.f32.partialorder %v1282_v30, 0.0 }
  0x40   :  { %v851_v42 = vadd.f32 %v603_v61, %v596_v53  ;;  %v270_v32 = vadd.f32 %v198_v51, %v126_v38  ;;  %v623_v39 = vand.u32 2147483648, %v1282_v30  ;;  %vm627_vm10 = vcmp.eq.f32.partialorder %v1284_v37, inf  ;;  %v128_v61 = vld [vmem:[#allocation2 + $0xe7] sm:$0xff] }
  0x41   :  { %vm629_vm11 = vcmp.eq.f32.partialorder %v1284_v37, 0.0  ;;  %918 = vrsqrt.f32 %v1327_v15  ;;  %v610_v45 = vsel %vm608_vm5, %v609_v24, %v607_v47  ;;  %v617_v23 = vsel %vm615_vm7, %v616_v52, %v614_v6  ;;  %v200_v6 = vld [vmem:[#allocation2 + $0xe9] sm:$0xff] }
  0x42   :  { %v630_v16 = vand.u32 2147483648, %v1284_v37  ;;  %920 = vrsqrt.f32 %v1329_v35  ;;  %v818_v17 = vadd.f32 %v817_v31, %v1284_v37  ;;  %v1345_v27 = vsub.f32 %v198_v51, %v126_v38 }
  0x43   :  { %v271_v28 = vadd.f32 %v199_v8, %v127_v14  ;;  %v1348_v36 = vadd.f32 %v1165_v58, %v270_v32  ;;  %v1350_v63 = vsub.f32 %v199_v8, %v127_v14  ;;  %v406_v62 = vadd.f32 %v374_v40, %v1195_v2  ;;  %v129_v32 = vld [vmem:[#allocation2 + $0xef] sm:$0xff] }
  0x44   :  { %v915_v41 = vpop.eup %914  ;;  %v407_v1 = vadd.f32 %v375_v50, %v1217_v7  ;;  %v852_v24 = vadd.f32 %v851_v42, %v610_v45  ;;  %v1361_v58 = vadd.f32 %v818_v17, %v1327_v15  ;;  %v201_v14 = vld [vmem:[#allocation2 + $0xf1] sm:$0xff]  ;;  %vm634_vm12 = vcmp.eq.f32.partialorder %v1327_v15, inf }
  0x45   :  { %v917_v52 = vpop.eup %916  ;;  %v619_v43 = vmul.f32 %v915_v41, %v1282_v30  ;;  %v1356_v44 = vadd.f32 %v1169_v59, %v271_v28  ;;  %v470_v0 = vsub.f32 %v1348_v36, %v1220_v22  ;;  %v438_v53 = vadd.f32 %v406_v62, %v1345_v27 }
  0x46   :  { %v626_v47 = vmul.f32 %v917_v52, %v1284_v37  ;;  %v439_v2 = vadd.f32 %v407_v1, %v1350_v63  ;;  %v853_v7 = vadd.f32 %v852_v24, %v617_v23  ;;  %v376_v59 = vadd.f32 %v1345_v27, %v1345_v27 }
  0x47   :  { %v621_v40 = vsel %vm620_vm8, %v1282_v30, %v619_v43  ;;  %v471_v22 = vsub.f32 %v1356_v44, %v1222_v25  ;;  %v534_v50 = vmul.f32 %v470_v0, %v470_v0  ;;  %v502_v51 = vmul.f32 %v438_v53, %v438_v53 }
  0x48   :  { %v624_v31 = vsel %vm622_vm9, %v623_v39, %v621_v40  ;;  %v628_v38 = vsel %vm627_vm10, %v1284_v37, %v626_v47  ;;  %v503_v42 = vmul.f32 %v439_v2, %v439_v2  ;;  %vm636_vm13 = vcmp.eq.f32.partialorder %v1327_v15, 0.0 }
  0x49   :  { %v535_v8 = vmul.f32 %v471_v22, %v471_v22  ;;  %v854_v25 = vadd.f32 %v853_v7, %v624_v31  ;;  %v631_v45 = vsel %vm629_vm11, %v630_v16, %v628_v38  ;;  %v637_v30 = vand.u32 2147483648, %v1327_v15 }
  0x4a   :  { %v1383_v39 = vadd.f32 %v534_v50, %v502_v51  ;;  %v272_v23 = vadd.f32 %v200_v6, %v128_v61  ;;  %v377_v28 = vadd.f32 %v1350_v63, %v1350_v63  ;;  %v273_v1 = vadd.f32 %v201_v14, %v129_v32  ;;  %v131_v50 = vld [vmem:[#allocation2 + $0x10f] sm:$0xff] }
  0x4b   :  { %v919_v17 = vpop.eup %918  ;;  %v1387_v41 = vadd.f32 %v535_v8, %v503_v42  ;;  %v855_v62 = vadd.f32 %v854_v25, %v631_v45  ;;  %v1391_v37 = vsub.f32 %v200_v6, %v128_v61  ;;  %v408_v16 = vadd.f32 %v376_v59, %v1269_v46  ;;  %v130_v46 = vld [vmem:[#allocation2 + $0x107] sm:$0xff]  ;;  %v203_v6 = vld [vmem:[#allocation2 + $0x111] sm:$0xff] }
  0x4c   :  { %v921_v24 = vpop.eup %920  ;;  %v633_v52 = vmul.f32 %v919_v17, %v1327_v15  ;;  %922 = vrsqrt.f32 %v1383_v39  ;;  %vm641_vm14 = vcmp.eq.f32.partialorder %v1329_v35, inf  ;;  %v1397_v0 = vsub.f32 %v201_v14, %v129_v32  ;;  %v202_v61 = vld [vmem:[#allocation2 + $0x109] sm:$0xff] }
  0x4d   :  { %v640_v43 = vmul.f32 %v921_v24, %v1329_v35  ;;  %924 = vrsqrt.f32 %v1387_v41  ;;  %vm643_vm15 = vcmp.eq.f32.partialorder %v1329_v35, 0.0  ;;  %v644_v53 = vand.u32 2147483648, %v1329_v35 }
  0x4e   :  { %v635_v47 = vsel %vm634_vm12, %v1327_v15, %v633_v52  ;;  %v1405_v2 = vadd.f32 %v1230_v26, %v272_v23  ;;  %v1411_v59 = vadd.f32 %v1234_v29, %v273_v1  ;;  %v409_v22 = vadd.f32 %v377_v28, %v1271_v54 }
  0x4f   :  { %v638_v7 = vsel %vm636_vm13, %v637_v30, %v635_v47  ;;  %v642_v40 = vsel %vm641_vm14, %v1329_v35, %v640_v43  ;;  %v378_v38 = vadd.f32 %v1391_v37, %v1391_v37  ;;  %v440_v26 = vadd.f32 %v408_v16, %v1391_v37 }
  0x50   :  { %v856_v31 = vadd.f32 %v855_v62, %v638_v7  ;;  %v472_v15 = vsub.f32 %v1405_v2, %v1274_v57  ;;  %v645_v51 = vsel %vm643_vm15, %v644_v53, %v642_v40  ;;  %v379_v42 = vadd.f32 %v1397_v0, %v1397_v0  ;;  %v132_v40 = vld [vmem:[#allocation2 + $0x127] sm:$0xff] }
  0x51   :  { %v441_v29 = vadd.f32 %v409_v22, %v1397_v0  ;;  %v473_v54 = vsub.f32 %v1411_v59, %v1278_v34  ;;  %v504_v32 = vmul.f32 %v440_v26, %v440_v26  ;;  %v274_v8 = vadd.f32 %v202_v61, %v130_v46  ;;  %v204_v22 = vld [vmem:[#allocation2 + $0x129] sm:$0xff]  ;;  %v1465_v26 = vld [vmem:[#allocation2 + $0x131] sm:$0xff] }
  0x52   :  { %v536_v14 = vmul.f32 %v472_v15, %v472_v15  ;;  %v275_v25 = vadd.f32 %v203_v6, %v131_v50  ;;  %v1424_v23 = vsub.f32 %v202_v61, %v130_v46  ;;  %v1426_v17 = vsub.f32 %v203_v6, %v131_v50 }
  0x53   :  { %v505_v45 = vmul.f32 %v441_v29, %v441_v29  ;;  %v537_v30 = vmul.f32 %v473_v54, %v473_v54  ;;  %v1431_v28 = vadd.f32 %v1238_v48, %v274_v8  ;;  %v410_v34 = vadd.f32 %v378_v38, %v1345_v27  ;;  %v1463_v38 = vld [vmem:[#allocation2 + $0x12f] sm:$0xff] }
  0x54   :  { %v1428_v57 = vadd.f32 %v536_v14, %v504_v32  ;;  %v1434_v62 = vadd.f32 %v1244_v33, %v275_v25  ;;  %v411_v24 = vadd.f32 %v379_v42, %v1350_v63  ;;  %v820_v52 = vadd.f32 %v1361_v58, %v1329_v35 }
  0x55   :  { %v1437_v1 = vadd.f32 %v537_v30, %v505_v45  ;;  %v857_v16 = vadd.f32 %v856_v31, %v645_v51  ;;  %vm648_vm0 = vcmp.eq.f32.partialorder %v1383_v39, inf  ;;  %vm650_vm1 = vcmp.eq.f32.partialorder %v1383_v39, 0.0 }
  0x56   :  { %v923_v43 = vpop.eup %922  ;;  %926 = vrsqrt.f32 %v1428_v57  ;;  %v313_v48 = vadd.f32 %v1065_v18, %v1065_v18  ;;  %v651_v47 = vand.u32 2147483648, %v1383_v39  ;;  %vm655_vm2 = vcmp.eq.f32.partialorder %v1387_v41, inf }
  0x57   :  { %v925_v33 = vpop.eup %924  ;;  %v647_v27 = vmul.f32 %v923_v43, %v1383_v39  ;;  %928 = vrsqrt.f32 %v1437_v1  ;;  %vm657_vm3 = vcmp.eq.f32.partialorder %v1387_v41, 0.0  ;;  %v442_v63 = vadd.f32 %v410_v34, %v1424_v23 }
  0x58   :  { %v654_v35 = vmul.f32 %v925_v33, %v1387_v41  ;;  %v443_v58 = vadd.f32 %v411_v24, %v1426_v17  ;;  %v474_v18 = vsub.f32 %v1431_v28, %v1348_v36  ;;  %v475_v46 = vsub.f32 %v1434_v62, %v1356_v44 }
  0x59   :  { %v649_v53 = vsel %vm648_vm0, %v1383_v39, %v647_v27  ;;  %v821_v7 = vadd.f32 %v820_v52, %v1383_v39  ;;  %v658_v61 = vand.u32 2147483648, %v1387_v41  ;;  %v506_v6 = vmul.f32 %v442_v63, %v442_v63 }
  0x5a   :  { %v656_v50 = vsel %vm655_vm2, %v1387_v41, %v654_v35  ;;  %v507_v31 = vmul.f32 %v443_v58, %v443_v58  ;;  %v652_v36 = vsel %vm650_vm1, %v651_v47, %v649_v53  ;;  %v538_v15 = vmul.f32 %v474_v18, %v474_v18  ;;  %v134_v53 = vld [vmem:[#allocation2 + $0x147] sm:$0xff] }
  0x5b   :  { %v539_v51 = vmul.f32 %v475_v46, %v475_v46  ;;  %v822_v44 = vadd.f32 %v821_v7, %v1387_v41  ;;  %v659_v42 = vsel %vm657_vm3, %v658_v61, %v656_v50  ;;  %v380_v29 = vadd.f32 %v1424_v23, %v1424_v23  ;;  %v135_v7 = vld [vmem:[#allocation2 + $0x14f] sm:$0xff] }
  0x5c   :  { %v858_v54 = vadd.f32 %v857_v16, %v652_v36  ;;  %v276_v32 = vadd.f32 %v204_v22, %v132_v40  ;;  %v1474_v14 = vadd.f32 %v538_v15, %v506_v6  ;;  %v277_v39 = vadd.f32 %v1465_v26, %v1463_v38 }
  0x5d   :  { %v1476_v8 = vadd.f32 %v539_v51, %v507_v31  ;;  %v823_v25 = vadd.f32 %v822_v44, %v1428_v57  ;;  %v1485_v41 = vsub.f32 %v204_v22, %v132_v40  ;;  %vm662_vm4 = vcmp.eq.f32.partialorder %v1428_v57, inf  ;;  %v207_v40 = vld [vmem:[#allocation2 + $0x151] sm:$0xff] }
  0x5e   :  { %v859_v45 = vadd.f32 %v858_v54, %v659_v42  ;;  %v1482_v30 = vadd.f32 %v1248_v13, %v276_v32  ;;  %930 = vrsqrt.f32 %v1474_v14  ;;  %vm664_vm5 = vcmp.eq.f32.partialorder %v1428_v57, 0.0 }
  0x5f   :  { %932 = vrsqrt.f32 %v1476_v8  ;;  %v314_v24 = vadd.f32 %v1073_v19, %v1073_v19  ;;  %v824_v13 = vadd.f32 %v823_v25, %v1437_v1  ;;  %v1494_v43 = vadd.f32 %v313_v48, %v277_v39 }
  0x60   :  { %v927_v34 = vpop.eup %926  ;;  %v412_v33 = vadd.f32 %v380_v29, %v1391_v37  ;;  %v665_v27 = vand.u32 2147483648, %v1428_v57  ;;  %vm669_vm6 = vcmp.eq.f32.partialorder %v1437_v1, inf  ;;  %v476_v35 = vsub.f32 %v1482_v30, %v1405_v2  ;;  %v206_v37 = vld [vmem:[#allocation2 + $0x149] sm:$0xff] }
  0x61   :  { %v929_v52 = vpop.eup %928  ;;  %v661_v16 = vmul.f32 %v927_v34, %v1428_v57  ;;  %v825_v63 = vadd.f32 %v824_v13, %v1474_v14  ;;  %v477_v48 = vsub.f32 %v1494_v43, %v1411_v59  ;;  %vm671_vm7 = vcmp.eq.f32.partialorder %v1437_v1, 0.0 }
  0x62   :  { %v668_v47 = vmul.f32 %v929_v52, %v1437_v1  ;;  %v444_v58 = vadd.f32 %v412_v33, %v1485_v41  ;;  %v672_v2 = vand.u32 2147483648, %v1437_v1  ;;  %v540_v6 = vmul.f32 %v476_v35, %v476_v35  ;;  %v136_v52 = vld [vmem:[#allocation2 + $0x167] sm:$0xff] }
  0x63   :  { %v663_v19 = vsel %vm662_vm4, %v1428_v57, %v661_v16  ;;  %v826_v22 = vadd.f32 %v825_v63, %v1476_v8  ;;  %v278_v59 = vadd.f32 %v206_v37, %v134_v53  ;;  %v279_v15 = vadd.f32 %v207_v40, %v135_v7  ;;  %v208_v16 = vld [vmem:[#allocation2 + $0x169] sm:$0xff] }
  0x64   :  { %v666_v18 = vsel %vm664_vm5, %v665_v27, %v663_v19  ;;  %v670_v46 = vsel %vm669_vm6, %v1437_v1, %v668_v47  ;;  %v508_v61 = vmul.f32 %v444_v58, %v444_v58  ;;  %v315_v57 = vadd.f32 %v1078_v20, %v1078_v20 }
  0x65   :  { %v860_v50 = vadd.f32 %v859_v45, %v666_v18  ;;  %v673_v31 = vsel %vm671_vm7, %v672_v2, %v670_v46  ;;  %v1515_v51 = vadd.f32 %v314_v24, %v278_v59  ;;  %vm676_vm8 = vcmp.eq.f32.partialorder %v1474_v14, inf }
  0x66   :  { %v679_v1 = vand.u32 2147483648, %v1474_v14  ;;  %v1519_v42 = vadd.f32 %v540_v6, %v508_v61  ;;  %v381_v54 = vadd.f32 %v1426_v17, %v1426_v17  ;;  %vm678_vm9 = vcmp.eq.f32.partialorder %v1474_v14, 0.0  ;;  %v137_v61 = vld [vmem:[#allocation2 + $0x16f] sm:$0xff] }
  0x67   :  { %v861_v36 = vadd.f32 %v860_v50, %v673_v31  ;;  %vm683_vm10 = vcmp.eq.f32.partialorder %v1476_v8, inf  ;;  %v686_v25 = vand.u32 2147483648, %v1476_v8  ;;  %v1531_v45 = vadd.f32 %v315_v57, %v279_v15  ;;  %v209_v6 = vld [vmem:[#allocation2 + $0x171] sm:$0xff] }
  0x68   :  { %v931_v44 = vpop.eup %930  ;;  %v1529_v39 = vadd.f32 %v826_v22, %v1519_v42  ;;  %vm685_vm11 = vcmp.eq.f32.partialorder %v1476_v8, 0.0  ;;  %v478_v24 = vsub.f32 %v1515_v51, %v1431_v28  ;;  %v316_v47 = vadd.f32 %v1083_v21, %v1083_v21 }
  0x69   :  { %v933_v29 = vpop.eup %932  ;;  %v675_v32 = vmul.f32 %v931_v44, %v1474_v14  ;;  %v479_v27 = vsub.f32 %v1531_v45, %v1434_v62  ;;  %v413_v19 = vadd.f32 %v381_v54, %v1397_v0  ;;  %v280_v58 = vadd.f32 %v208_v16, %v136_v52 }
  0x6a   :  { %v682_v20 = vmul.f32 %v933_v29, %v1476_v8  ;;  %v541_v22 = vmul.f32 %v477_v48, %v477_v48  ;;  %v242_v50 = vsub.f32 %v206_v37, %v134_v53  ;;  %v243_v0 = vsub.f32 %v207_v40, %v135_v7  ;;  %v138_v48 = vld [vmem:[#allocation2 + $0x187] sm:$0xff]  ;;  %v139_v7 = vld [vmem:[#allocation2 + $0x18f] sm:$0xff] }
  0x6b   :  { %v677_v34 = vsel %vm676_vm8, %v1474_v14, %v675_v32  ;;  %v241_v14 = vsub.f32 %v1465_v26, %v1463_v38  ;;  %v1547_v18 = vadd.f32 %v316_v47, %v280_v58  ;;  %v1557_v44 = vsub.f32 %v208_v16, %v136_v52  ;;  %v211_v40 = vld [vmem:[#allocation2 + $0x191] sm:$0xff] }
  0x6c   :  { %v680_v13 = vsel %vm678_vm9, %v679_v1, %v677_v34  ;;  %v684_v33 = vsel %vm683_vm10, %v1476_v8, %v682_v20  ;;  %v382_v8 = vadd.f32 %v1485_v41, %v1485_v41  ;;  %v385_v15 = vadd.f32 %v243_v0, %v243_v0  ;;  %v1582_v47 = vld [vmem:[#allocation2 + $0x22f] sm:$0xff] }
  0x6d   :  { %v862_v35 = vadd.f32 %v861_v36, %v680_v13  ;;  %v687_v63 = vsel %vm685_vm11, %v686_v25, %v684_v33  ;;  %v445_v46 = vadd.f32 %v413_v19, %v241_v14  ;;  %v383_v62 = vadd.f32 %v241_v14, %v241_v14  ;;  %v1566_v25 = vld [vmem:[#allocation2 + $0x227] sm:$0xff] }
  0x6e   :  { %v480_v21 = vsub.f32 %v1547_v18, %v1482_v30  ;;  %v414_v38 = vadd.f32 %v382_v8, %v1424_v23  ;;  %v384_v36 = vadd.f32 %v242_v50, %v242_v50  ;;  %v281_v1 = vadd.f32 %v209_v6, %v137_v61 }
  0x6f   :  { %v1545_v28 = vadd.f32 %v862_v35, %v687_v63  ;;  %v509_v2 = vmul.f32 %v445_v46, %v445_v46  ;;  %v415_v26 = vadd.f32 %v383_v62, %v1426_v17  ;;  %v317_v30 = vadd.f32 %v1135_v9, %v1135_v9  ;;  %v210_v17 = vld [vmem:[#allocation2 + $0x189] sm:$0xff]  ;;  %v1584_v35 = vld [vmem:[#allocation2 + $0x231] sm:$0xff] }
  0x70   :  { %v446_v59 = vadd.f32 %v414_v38, %v242_v50  ;;  %934 = vrsqrt.f32 %v1519_v42  ;;  %v1562_v23 = vsub.f32 %v209_v6, %v137_v61  ;;  %v542_v37 = vmul.f32 %v478_v24, %v478_v24  ;;  %v1568_v9 = vld [vmem:[#allocation2 + $0x229] sm:$0xff] }
  0x71   :  { %v1555_v31 = vadd.f32 %v541_v22, %v509_v2  ;;  %v447_v57 = vadd.f32 %v415_v26, %v243_v0  ;;  %v543_v54 = vmul.f32 %v479_v27, %v479_v27  ;;  %v416_v32 = vadd.f32 %v384_v36, %v1485_v41  ;;  %v212_v6 = vld [vmem:[#allocation2 + $0x1a9] sm:$0xff] }
  0x72   :  { %v510_v53 = vmul.f32 %v446_v59, %v446_v59  ;;  %v417_v20 = vadd.f32 %v385_v15, %v241_v14  ;;  %v1570_v34 = vadd.f32 %v317_v30, %v281_v1  ;;  %v386_v52 = vadd.f32 %v1557_v44, %v1557_v44  ;;  %v213_v15 = vld [vmem:[#allocation2 + $0x1b1] sm:$0xff] }
  0x73   :  { %936 = vrsqrt.f32 %v1555_v31  ;;  %v511_v29 = vmul.f32 %v447_v57, %v447_v57  ;;  %v318_v16 = vadd.f32 %v1140_v49, %v1140_v49  ;;  %v282_v24 = vadd.f32 %v210_v17, %v138_v48 }
  0x74   :  { %v387_v13 = vadd.f32 %v1562_v23, %v1562_v23  ;;  %v283_v33 = vadd.f32 %v211_v40, %v139_v7  ;;  %v319_v41 = vadd.f32 %v1148_v10, %v1148_v10  ;;  %v1580_v27 = vadd.f32 %v542_v37, %v510_v53 }
  0x75   :  { %v1588_v14 = vadd.f32 %v1568_v9, %v1566_v25  ;;  %v1590_v19 = vadd.f32 %v543_v54, %v511_v29  ;;  %v448_v49 = vadd.f32 %v416_v32, %v1557_v44  ;;  %v449_v63 = vadd.f32 %v417_v20, %v1562_v23 }
  0x76   :  { %v481_v58 = vsub.f32 %v1570_v34, %v1494_v43  ;;  %v1596_v10 = vsub.f32 %v210_v17, %v138_v48  ;;  %v1598_v8 = vadd.f32 %v318_v16, %v282_v24  ;;  %v418_v46 = vadd.f32 %v386_v52, %v242_v50  ;;  %v140_v43 = vld [vmem:[#allocation2 + $0x1a7] sm:$0xff] }
  0x77   :  { %v1600_v62 = vsub.f32 %v211_v40, %v139_v7  ;;  %v1602_v2 = vadd.f32 %v319_v41, %v283_v33  ;;  %v419_v22 = vadd.f32 %v387_v13, %v243_v0  ;;  %v1610_v61 = vadd.f32 %v1584_v35, %v1582_v47  ;;  %v141_v0 = vld [vmem:[#allocation2 + $0x1af] sm:$0xff] }
  0x78   :  { %938 = vrsqrt.f32 %v1580_v27  ;;  %v512_v59 = vmul.f32 %v448_v49, %v448_v49  ;;  %v544_v36 = vmul.f32 %v480_v21, %v480_v21  ;;  %v513_v1 = vmul.f32 %v449_v63, %v449_v63 }
  0x79   :  { %940 = vrsqrt.f32 %v1590_v19  ;;  %v545_v30 = vmul.f32 %v481_v58, %v481_v58  ;;  %v450_v48 = vadd.f32 %v418_v46, %v1596_v10  ;;  %v482_v17 = vsub.f32 %v1598_v8, %v1515_v51 }
  0x7a   :  { %v935_v50 = vpop.eup %934  ;;  %v451_v53 = vadd.f32 %v419_v22, %v1600_v62  ;;  %v483_v37 = vsub.f32 %v1602_v2, %v1531_v45  ;;  %v320_v7 = vadd.f32 %v1153_v55, %v1153_v55  ;;  %v284_v40 = vadd.f32 %v212_v6, %v140_v43  ;;  %v219_v22 = vld [vmem:[#allocation2 + $0x211] sm:$0xff] }
  0x7b   :  { %v388_v21 = vadd.f32 %v1596_v10, %v1596_v10  ;;  %v389_v29 = vadd.f32 %v1600_v62, %v1600_v62  ;;  %v285_v54 = vadd.f32 %v213_v15, %v141_v0  ;;  %v321_v32 = vadd.f32 %v1158_v56, %v1158_v56 }
  0x7c   :  { %v689_v51 = vmul.f32 %v935_v50, %v1519_v42  ;;  %vm690_vm12 = vcmp.eq.f32.partialorder %v1519_v42, inf  ;;  %vm697_vm13 = vcmp.eq.f32.partialorder %v1555_v31, inf  ;;  %v1632_v55 = vadd.f32 %v544_v36, %v512_v59  ;;  %v142_v59 = vld [vmem:[#allocation2 + $0x1c7] sm:$0xff] }
  0x7d   :  { %v937_v57 = vpop.eup %936  ;;  %v1634_v20 = vadd.f32 %v545_v30, %v513_v1  ;;  %v514_v52 = vmul.f32 %v450_v48, %v450_v48  ;;  %v546_v16 = vmul.f32 %v482_v17, %v482_v17  ;;  %v515_v24 = vmul.f32 %v451_v53, %v451_v53  ;;  %v218_v50 = vld [vmem:[#allocation2 + $0x209] sm:$0xff] }
  0x7e   :  { %v696_v45 = vmul.f32 %v937_v57, %v1555_v31  ;;  %v547_v13 = vmul.f32 %v483_v37, %v483_v37  ;;  %v1636_v33 = vsub.f32 %v212_v6, %v140_v43  ;;  %v1638_v41 = vadd.f32 %v320_v7, %v284_v40  ;;  %v147_v6 = vld [vmem:[#allocation2 + $0x20f] sm:$0xff] }
  0x7f   :  { %1891 = vst [vmem:[#allocation3_spill] sm:$0xff] %v1634_v20  ;;  %v1640_v56 = vsub.f32 %v213_v15, %v141_v0  ;;  %v1642_v49 = vadd.f32 %v321_v32, %v285_v54  ;;  %v420_v63 = vadd.f32 %v388_v21, %v1557_v44  ;;  %v421_v58 = vadd.f32 %v389_v29, %v1562_v23  ;;  %v143_v23 = vld [vmem:[#allocation2 + $0x1cf] sm:$0xff] }
  0x80   :  { %v1652_v43 = vsel %vm690_vm12, %v1519_v42, %v689_v51  ;;  %942 = vrsqrt.f32 %v1632_v55  ;;  %v1656_v44 = vadd.f32 %v546_v16, %v514_v52  ;;  %v214_v0 = vld [vmem:[#allocation2 + $0x1c9] sm:$0xff]  ;;  %v215_v15 = vld [vmem:[#allocation2 + $0x1d1] sm:$0xff]  ;;  %v1661_v1 = vsel %vm697_vm13, %v1555_v31, %v696_v45 }
  0x81   :  { %944 = vrsqrt.f32 %v1634_v20  ;;  %v1664_v30 = vadd.f32 %v547_v13, %v515_v24  ;;  %v484_v48 = vsub.f32 %v1638_v41, %v1547_v18  ;;  %v452_v17 = vadd.f32 %v420_v63, %v1636_v33  ;;  %v144_v52 = vld [vmem:[#allocation2 + $0x1e7] sm:$0xff]  ;;  %v145_v63 = vld [vmem:[#allocation2 + $0x1ef] sm:$0xff] }
  0x82   :  { %v939_v36 = vpop.eup %938  ;;  %1892 = vst [vmem:[#allocation4_spill] sm:$0xff] %v1656_v44  ;;  %v453_v53 = vadd.f32 %v421_v58, %v1640_v56  ;;  %v485_v37 = vsub.f32 %v1642_v49, %v1570_v34  ;;  %v322_v7 = vadd.f32 %v1177_v60, %v1177_v60  ;;  %v250_v40 = vsub.f32 %v214_v0, %v142_v59  ;;  %v217_v58 = vld [vmem:[#allocation2 + $0x1f1] sm:$0xff] }
  0x83   :  { %v941_v57 = vpop.eup %940  ;;  %1893 = vst [vmem:[#allocation5_spill] sm:$0xff] %v1664_v30  ;;  %v286_v21 = vadd.f32 %v214_v0, %v142_v59  ;;  %v287_v29 = vadd.f32 %v215_v15, %v143_v23  ;;  %v323_v54 = vadd.f32 %v1182_v11, %v1182_v11  ;;  %v1677_v32 = vmul.f32 %v939_v36, %v1580_v27  ;;  %v216_v11 = vld [vmem:[#allocation2 + $0x1e9] sm:$0xff] }
  0x84   :  { %946 = vrsqrt.f32 %v1656_v44  ;;  %v390_v18 = vadd.f32 %v1636_v33, %v1636_v33  ;;  %v251_v51 = vsub.f32 %v215_v15, %v143_v23  ;;  %v1683_v34 = vmul.f32 %v941_v57, %v1590_v19  ;;  %v146_v36 = vld [vmem:[#allocation2 + $0x207] sm:$0xff] }
  0x85   :  { %948 = vrsqrt.f32 %v1664_v30  ;;  %v391_v60 = vadd.f32 %v1640_v56, %v1640_v56  ;;  %v548_v45 = vmul.f32 %v484_v48, %v484_v48  ;;  %v516_v16 = vmul.f32 %v452_v17, %v452_v17 }
  0x86   :  { %v517_v24 = vmul.f32 %v453_v53, %v453_v53  ;;  %v549_v13 = vmul.f32 %v485_v37, %v485_v37  ;;  %v252_v59 = vsub.f32 %v216_v11, %v144_v52  ;;  %v358_v0 = vadd.f32 %v322_v7, %v286_v21 }
  0x87   :  { %v1688_v23 = vadd.f32 %v323_v54, %v287_v29  ;;  %v392_v15 = vadd.f32 %v250_v40, %v250_v40  ;;  %v253_v57 = vsub.f32 %v217_v58, %v145_v63  ;;  %v393_v46 = vadd.f32 %v251_v51, %v251_v51 }
  0x88   :  { %v422_v48 = vadd.f32 %v390_v18, %v1596_v10  ;;  %v254_v26 = vsub.f32 %v218_v50, %v146_v36  ;;  %v255_v38 = vsub.f32 %v219_v22, %v147_v6  ;;  %v324_v17 = vadd.f32 %v1187_v12, %v1187_v12 }
  0x89   :  { %v288_v53 = vadd.f32 %v216_v11, %v144_v52  ;;  %v289_v37 = vadd.f32 %v217_v58, %v145_v63  ;;  %v325_v7 = vadd.f32 %v1203_v3, %v1203_v3  ;;  %v423_v29 = vadd.f32 %v391_v60, %v1600_v62 }
  0x8a   :  { %v943_v21 = vpop.eup %942  ;;  %v394_v54 = vadd.f32 %v252_v59, %v252_v59  ;;  %v326_v30 = vadd.f32 %v1208_v4, %v1208_v4  ;;  %v290_v44 = vadd.f32 %v218_v50, %v146_v36  ;;  %v1700_v10 = vadd.f32 %v548_v45, %v516_v16 }
  0x8b   :  { %v1698_v20 = vpop.eup %944  ;;  %v486_v18 = vsub.f32 %v358_v0, %v1598_v8  ;;  %v487_v12 = vsub.f32 %v1688_v23, %v1602_v2  ;;  %v395_v52 = vadd.f32 %v253_v57, %v253_v57  ;;  %vm704_vm14 = vcmp.eq.f32.partialorder %v1580_v27, inf }
  0x8c   :  { %v291_v3 = vadd.f32 %v219_v22, %v147_v6  ;;  %v327_v62 = vadd.f32 %v1213_v5, %v1213_v5  ;;  %v396_v60 = vadd.f32 %v254_v26, %v254_v26  ;;  %v397_v11 = vadd.f32 %v255_v38, %v255_v38 }
  0x8d   :  { %v360_v4 = vadd.f32 %v324_v17, %v288_v53  ;;  %v361_v50 = vadd.f32 %v325_v7, %v289_v37  ;;  %v424_v63 = vadd.f32 %v392_v15, %v1636_v33  ;;  %v425_v45 = vadd.f32 %v393_v46, %v1640_v56 }
  0x8e   :  { %v1710_v16 = vpop.eup %946  ;;  %vm692_vm15 = vcmp.eq.f32.partialorder %v1519_v42, 0.0  ;;  %vm699_vm0 = vcmp.eq.f32.partialorder %v1555_v31, 0.0  ;;  %v454_v8 = vadd.f32 %v422_v48, %v250_v40  ;;  %v455_v2 = vadd.f32 %v423_v29, %v251_v51 }
  0x8f   :  { %v362_v22 = vadd.f32 %v326_v30, %v290_v44  ;;  %v426_v6 = vadd.f32 %v394_v54, %v250_v40  ;;  %v1714_v58 = vpop.eup %948  ;;  %vm711_vm1 = vcmp.eq.f32.partialorder %v1590_v19, inf  ;;  %v1717_v5 = vadd.f32 %v549_v13, %v517_v24 }
  0x90   :  { %950 = vrsqrt.f32 %v1700_v10  ;;  %v550_v33 = vmul.f32 %v486_v18, %v486_v18  ;;  %v551_v56 = vmul.f32 %v487_v12, %v487_v12  ;;  %v363_v46 = vadd.f32 %v327_v62, %v291_v3 }
  0x91   :  { %v427_v36 = vadd.f32 %v395_v52, %v251_v51  ;;  %v428_v15 = vadd.f32 %v396_v60, %v252_v59  ;;  %v429_v17 = vadd.f32 %v397_v11, %v253_v57  ;;  %v456_v53 = vadd.f32 %v424_v63, %v252_v59 }
  0x92   :  { %v457_v37 = vadd.f32 %v425_v45, %v253_v57  ;;  %v488_v48 = vsub.f32 %v360_v4, %v1638_v41  ;;  %v489_v44 = vsub.f32 %v361_v50, %v1642_v49  ;;  %v518_v30 = vmul.f32 %v454_v8, %v454_v8 }
  0x93   :  { %v519_v40 = vmul.f32 %v455_v2, %v455_v2  ;;  %v458_v7 = vadd.f32 %v426_v6, %v254_v26  ;;  %v490_v29 = vsub.f32 %v362_v22, %v358_v0  ;;  %v717_v24 = vmul.f32 %v943_v21, %v1632_v55 }
  0x94   :  { %952 = vrsqrt.f32 %v1717_v5  ;;  %v492_v13 = vsub.f32 %v1588_v14, %v360_v4  ;;  %v493_v51 = vsub.f32 %v1610_v61, %v361_v50  ;;  %v459_v54 = vadd.f32 %v427_v36, %v255_v38 }
  0x95   :  { %v491_v59 = vsub.f32 %v363_v46, %v1688_v23  ;;  %v1894_v41 = vsub.f32 %v1568_v9, %v1566_v25  ;;  %v1895_v49 = vsub.f32 %v1584_v35, %v1582_v47  ;;  %v520_v0 = vmul.f32 %v456_v53, %v456_v53  ;;  %v1899_v46 = vld [vmem:[#allocation3_spill] sm:$0xff]  ;;  %v1900_v53 = vld [vmem:[#allocation4_spill] sm:$0xff] }
  0x96   :  { %v521_v18 = vmul.f32 %v457_v37, %v457_v37  ;;  %v552_v21 = vmul.f32 %v488_v48, %v488_v48  ;;  %v553_v12 = vmul.f32 %v489_v44, %v489_v44  ;;  %v1733_v52 = vadd.f32 %v550_v33, %v518_v30 }
  0x97   :  { %v460_v57 = vadd.f32 %v428_v15, %v1894_v41  ;;  %v461_v26 = vadd.f32 %v429_v17, %v1895_v49  ;;  %v1735_v14 = vadd.f32 %v551_v56, %v519_v40  ;;  %v522_v61 = vmul.f32 %v458_v7, %v458_v7  ;;  %v1902_v40 = vld [vmem:[#allocation5_spill] sm:$0xff] }
  0x98   :  { %v554_v38 = vmul.f32 %v490_v29, %v490_v29  ;;  %v556_v3 = vmul.f32 %v492_v13, %v492_v13  ;;  %v557_v23 = vmul.f32 %v493_v51, %v493_v51  ;;  %v705_v25 = vsel %vm704_vm14, %v1580_v27, %v1677_v32 }
  0x99   :  { %vm706_vm2 = vcmp.eq.f32.partialorder %v1580_v27, 0.0  ;;  %v523_v9 = vmul.f32 %v459_v54, %v459_v54  ;;  %v555_v47 = vmul.f32 %v491_v59, %v491_v59  ;;  %v524_v35 = vmul.f32 %v460_v57, %v460_v57 }
  0x9a   :  { %v525_v62 = vmul.f32 %v461_v26, %v461_v26  ;;  %v951_v60 = vpop.eup %950  ;;  %v1742_v11 = vadd.f32 %v552_v21, %v520_v0  ;;  %v1744_v4 = vadd.f32 %v553_v12, %v521_v18  ;;  %v1896_v50 = vand.u32 2147483648, %v1519_v42 }
  0x9b   :  { %v1897_v32 = vand.u32 2147483648, %v1555_v31  ;;  %v1756_v8 = vadd.f32 %v554_v38, %v522_v61  ;;  %v1898_v2 = vand.u32 2147483648, %v1580_v27  ;;  %v712_v6 = vsel %vm711_vm1, %v1590_v19, %v1683_v34 }
  0x9c   :  { %v694_v63 = vsel %vm692_vm15, %v1896_v50, %v1652_v43  ;;  %vm713_vm3 = vcmp.eq.f32.partialorder %v1590_v19, 0.0  ;;  %vm718_vm4 = vcmp.eq.f32.partialorder %v1632_v55, inf  ;;  %954 = vrsqrt.f32 %v1733_v52 }
  0x9d   :  { %v701_v45 = vsel %vm699_vm0, %v1897_v32, %v1661_v1  ;;  %v708_v22 = vsel %vm706_vm2, %v1898_v2, %v705_v25  ;;  %v828_v42 = vadd.f32 %v1529_v39, %v1555_v31  ;;  %v864_v43 = vadd.f32 %v1545_v28, %v694_v63 }
  0x9e   :  { %v1770_v1 = vadd.f32 %v555_v47, %v523_v9  ;;  %v1772_v33 = vadd.f32 %v556_v3, %v524_v35  ;;  %v1774_v56 = vadd.f32 %v557_v23, %v525_v62  ;;  %v724_v34 = vmul.f32 %v1698_v20, %v1899_v46  ;;  %v953_v36 = vpop.eup %952 }
  0x9f   :  { %vm725_vm5 = vcmp.eq.f32.partialorder %v1899_v46, inf  ;;  %956 = vrsqrt.f32 %v1735_v14  ;;  %v829_v15 = vadd.f32 %v828_v42, %v1580_v27  ;;  %v865_v17 = vadd.f32 %v864_v43, %v701_v45 }
  0xa0   :  { %v719_v39 = vsel %vm718_vm4, %v1632_v55, %v717_v24  ;;  %vm720_vm6 = vcmp.eq.f32.partialorder %v1632_v55, 0.0  ;;  %v721_v28 = vand.u32 2147483648, %v1632_v55  ;;  %v728_v31 = vand.u32 2147483648, %v1899_v46 }
  0xa1   :  { %v731_v37 = vmul.f32 %v1710_v16, %v1900_v53  ;;  %958 = vrsqrt.f32 %v1742_v11  ;;  %v830_v20 = vadd.f32 %v829_v15, %v1590_v19  ;;  %v866_v48 = vadd.f32 %v865_v17, %v708_v22 }
  0xa2   :  { %v1901_v44 = vand.u32 2147483648, %v1590_v19  ;;  %v726_v30 = vsel %vm725_vm5, %v1899_v46, %v724_v34  ;;  %vm727_vm7 = vcmp.eq.f32.partialorder %v1899_v46, 0.0  ;;  %vm732_vm8 = vcmp.eq.f32.partialorder %v1900_v53, inf }
  0xa3   :  { %v738_v7 = vmul.f32 %v1714_v58, %v1902_v40  ;;  %960 = vrsqrt.f32 %v1744_v4  ;;  %v831_v16 = vadd.f32 %v830_v20, %v1632_v55  ;;  %v722_v24 = vsel %vm720_vm6, %v721_v28, %v719_v39 }
  0xa4   :  { %v715_v27 = vsel %vm713_vm3, %v1901_v44, %v712_v6  ;;  %vm734_vm9 = vcmp.eq.f32.partialorder %v1900_v53, 0.0  ;;  %v735_v19 = vand.u32 2147483648, %v1900_v53  ;;  %vm739_vm10 = vcmp.eq.f32.partialorder %v1902_v40, inf }
  0xa5   :  { %v867_v29 = vadd.f32 %v866_v48, %v715_v27  ;;  %v729_v13 = vsel %vm727_vm7, %v728_v31, %v726_v30  ;;  %v733_v51 = vsel %vm732_vm8, %v1900_v53, %v731_v37  ;;  %962 = vrsqrt.f32 %v1756_v8 }
  0xa6   :  { %v832_v54 = vadd.f32 %v831_v16, %v1899_v46  ;;  %vm741_vm11 = vcmp.eq.f32.partialorder %v1902_v40, 0.0  ;;  %v742_v58 = vand.u32 2147483648, %v1902_v40  ;;  %v745_v55 = vmul.f32 %v951_v60, %v1700_v10  ;;  %v955_v41 = vpop.eup %954 }
  0xa7   :  { %v868_v59 = vadd.f32 %v867_v29, %v722_v24  ;;  %v740_v57 = vsel %vm739_vm10, %v1902_v40, %v738_v7  ;;  %vm746_vm12 = vcmp.eq.f32.partialorder %v1700_v10, inf  ;;  %964 = vrsqrt.f32 %v1770_v1 }
  0xa8   :  { %v833_v49 = vadd.f32 %v832_v54, %v1900_v53  ;;  %v736_v26 = vsel %vm734_vm9, %v735_v19, %v733_v51  ;;  %vm748_vm13 = vcmp.eq.f32.partialorder %v1700_v10, 0.0  ;;  %v752_v0 = vmul.f32 %v953_v36, %v1717_v5 }
  0xa9   :  { %v869_v18 = vadd.f32 %v868_v59, %v729_v13  ;;  %v957_v21 = vpop.eup %956  ;;  %v749_v12 = vand.u32 2147483648, %v1700_v10  ;;  %vm753_vm14 = vcmp.eq.f32.partialorder %v1717_v5, inf  ;;  %966 = vrsqrt.f32 %v1772_v33 }
  0xaa   :  { %v834_v61 = vadd.f32 %v833_v49, %v1902_v40  ;;  %v743_v38 = vsel %vm741_vm11, %v742_v58, %v740_v57  ;;  %v747_v3 = vsel %vm746_vm12, %v1700_v10, %v745_v55  ;;  %v759_v23 = vmul.f32 %v955_v41, %v1733_v52 }
  0xab   :  { %v870_v25 = vadd.f32 %v869_v18, %v736_v26  ;;  %v959_v9 = vpop.eup %958  ;;  %v756_v47 = vand.u32 2147483648, %v1717_v5  ;;  %vm760_vm15 = vcmp.eq.f32.partialorder %v1733_v52, inf  ;;  %968 = vrsqrt.f32 %v1774_v56 }
  0xac   :  { %v835_v35 = vadd.f32 %v834_v61, %v1700_v10  ;;  %v754_v62 = vsel %vm753_vm14, %v1717_v5, %v752_v0  ;;  %vm755_vm0 = vcmp.eq.f32.partialorder %v1717_v5, 0.0  ;;  %v766_v60 = vmul.f32 %v957_v21, %v1735_v14 }
  0xad   :  { %v871_v50 = vadd.f32 %v870_v25, %v743_v38  ;;  %v961_v63 = vpop.eup %960  ;;  %v750_v32 = vsel %vm748_vm13, %v749_v12, %v747_v3  ;;  %v763_v45 = vand.u32 2147483648, %v1733_v52  ;;  %vm767_vm1 = vcmp.eq.f32.partialorder %v1735_v14, inf }
  0xae   :  { %v836_v2 = vadd.f32 %v835_v35, %v1717_v5  ;;  %v761_v22 = vsel %vm760_vm15, %v1733_v52, %v759_v23  ;;  %vm762_vm2 = vcmp.eq.f32.partialorder %v1733_v52, 0.0  ;;  %v773_v6 = vmul.f32 %v959_v9, %v1742_v11 }
  0xaf   :  { %v872_v42 = vadd.f32 %v871_v50, %v750_v32  ;;  %v963_v43 = vpop.eup %962  ;;  %v757_v46 = vsel %vm755_vm0, %v756_v47, %v754_v62  ;;  %v770_v34 = vand.u32 2147483648, %v1735_v14  ;;  %vm774_vm3 = vcmp.eq.f32.partialorder %v1742_v11, inf }
  0xb0   :  { %v837_v10 = vadd.f32 %v836_v2, %v1733_v52  ;;  %v768_v36 = vsel %vm767_vm1, %v1735_v14, %v766_v60  ;;  %vm769_vm4 = vcmp.eq.f32.partialorder %v1735_v14, 0.0  ;;  %v780_v5 = vmul.f32 %v961_v63, %v1744_v4 }
  0xb1   :  { %v873_v15 = vadd.f32 %v872_v42, %v757_v46  ;;  %v965_v17 = vpop.eup %964  ;;  %v764_v39 = vsel %vm762_vm2, %v763_v45, %v761_v22  ;;  %v777_v28 = vand.u32 2147483648, %v1742_v11  ;;  %vm781_vm5 = vcmp.eq.f32.partialorder %v1744_v4, inf }
  0xb2   :  { %v838_v31 = vadd.f32 %v837_v10, %v1735_v14  ;;  %v775_v53 = vsel %vm774_vm3, %v1742_v11, %v773_v6  ;;  %vm776_vm6 = vcmp.eq.f32.partialorder %v1742_v11, 0.0  ;;  %v787_v52 = vmul.f32 %v963_v43, %v1756_v8 }
  0xb3   :  { %v874_v37 = vadd.f32 %v873_v15, %v764_v39  ;;  %v967_v20 = vpop.eup %966  ;;  %v771_v48 = vsel %vm769_vm4, %v770_v34, %v768_v36  ;;  %v784_v44 = vand.u32 2147483648, %v1744_v4  ;;  %vm788_vm7 = vcmp.eq.f32.partialorder %v1756_v8, inf }
  0xb4   :  { %v839_v27 = vadd.f32 %v838_v31, %v1742_v11  ;;  %v782_v30 = vsel %vm781_vm5, %v1744_v4, %v780_v5  ;;  %vm783_vm8 = vcmp.eq.f32.partialorder %v1744_v4, 0.0  ;;  %v794_v14 = vmul.f32 %v965_v17, %v1770_v1 }
  0xb5   :  { %v875_v40 = vadd.f32 %v874_v37, %v771_v48  ;;  %v969_v7 = vpop.eup %968  ;;  %v778_v16 = vsel %vm776_vm6, %v777_v28, %v775_v53  ;;  %v791_v29 = vand.u32 2147483648, %v1756_v8  ;;  %vm795_vm9 = vcmp.eq.f32.partialorder %v1770_v1, inf }
  0xb6   :  { %v840_v24 = vadd.f32 %v839_v27, %v1744_v4  ;;  %v789_v19 = vsel %vm788_vm7, %v1756_v8, %v787_v52  ;;  %vm790_vm10 = vcmp.eq.f32.partialorder %v1756_v8, 0.0  ;;  %v801_v11 = vmul.f32 %v967_v20, %v1772_v33 }
  0xb7   :  { %v876_v13 = vadd.f32 %v875_v40, %v778_v16  ;;  %v785_v51 = vsel %vm783_vm8, %v784_v44, %v782_v30  ;;  %v798_v54 = vand.u32 2147483648, %v1770_v1  ;;  %vm802_vm11 = vcmp.eq.f32.partialorder %v1772_v33, inf }
  0xb8   :  { %v841_v58 = vadd.f32 %v840_v24, %v1756_v8  ;;  %v796_v55 = vsel %vm795_vm9, %v1770_v1, %v794_v14  ;;  %vm797_vm12 = vcmp.eq.f32.partialorder %v1770_v1, 0.0  ;;  %v808_v4 = vmul.f32 %v969_v7, %v1774_v56 }
  0xb9   :  { %v877_v59 = vadd.f32 %v876_v13, %v785_v51  ;;  %v792_v41 = vsel %vm790_vm10, %v791_v29, %v789_v19  ;;  %v805_v57 = vand.u32 2147483648, %v1772_v33  ;;  %vm809_vm13 = vcmp.eq.f32.partialorder %v1774_v56, inf }
  0xba   :  { %v842_v49 = vadd.f32 %v841_v58, %v1770_v1  ;;  %v803_v26 = vsel %vm802_vm11, %v1772_v33, %v801_v11  ;;  %vm804_vm14 = vcmp.eq.f32.partialorder %v1772_v33, 0.0  ;;  %v799_v8 = vsel %vm797_vm12, %v798_v54, %v796_v55 }
  0xbb   :  { %v878_v0 = vadd.f32 %v877_v59, %v792_v41  ;;  %v812_v18 = vand.u32 2147483648, %v1774_v56  ;;  %v810_v12 = vsel %vm809_vm13, %v1774_v56, %v808_v4  ;;  %vm811_vm15 = vcmp.eq.f32.partialorder %v1774_v56, 0.0 }
  0xbc   :  { %v843_v21 = vadd.f32 %v842_v49, %v1772_v33  ;;  %v806_v38 = vsel %vm804_vm14, %v805_v57, %v803_v26 }
  0xbd   :  { %v879_v61 = vadd.f32 %v878_v0, %v799_v8  ;;  %v813_v1 = vsel %vm811_vm15, %v812_v18, %v810_v12 }
  0xbe   :  { %v844_v3 = vadd.f32 %v843_v21, %v1774_v56 }
  0xbf   :  { %v880_v23 = vadd.f32 %v879_v61, %v806_v38 }
  0xc0   :  { %v845_v25 = vrot.slane %v844_v3, 4 }
  0xc1   :  { %v881_v9 = vadd.f32 %v880_v23, %v813_v1 }
  0xc2   :  { %v846_v47 = vadd.f32 %v845_v25, %v844_v3 }
  0xc3   :  { %v882_v35 = vrot.slane %v881_v9, 4 }
  0xc4   :  { %v847_v62 = vrot.slane %v846_v47, 2 }
  0xc5   :  { %v883_v60 = vadd.f32 %v882_v35, %v881_v9 }
  0xc6   :  { %v848_v50 = vadd.f32 %v847_v62, %v846_v47 }
  0xc7   :  { %v884_v63 = vrot.slane %v883_v60, 2 }
  0xc8   :  { %v849_v32 = vrot.slane %v848_v50, 1 }
  0xc9   :  { %v885_v33 = vadd.f32 %v884_v63, %v883_v60 }
  0xca   :  { %v850_v2 = vadd.f32 %v849_v32, %v848_v50 }
  0xcb   :  { %v886_v45 = vrot.slane %v885_v33, 1 }
  0xcc   :  { %v888_v42 = vmul.f32 0.0009765625, %v850_v2 }
  0xcd   :  { %v887_v22 = vadd.f32 %v886_v45, %v885_v33 }
  0xcf   :  { %v889_v6 = vmul.f32 0.001953125, %v887_v22 }
  0xd1   :  { %v890_v43 = vmul.f32 %v889_v6, %v889_v6 }
  0xd3   :  { %v891_v46 = vsub.f32 %v888_v42, %v890_v43 }
  0xd5   :  { %v892_v56 = vmax.f32 %v891_v46, 0.0 }
  0xd7   :  { %970 = vrsqrt.f32 %v892_v56  ;;  %vm895_vm0 = vcmp.eq.f32.partialorder %v892_v56, inf  ;;  %v898_v36 = vand.u32 2147483648, %v892_v56  ;;  %vm897_vm1 = vcmp.eq.f32.partialorder %v892_v56, 0.0 }
  0xe1   :  { %v971_v34 = vpop.eup %970 }
  0xe2   :  { %v894_v10 = vmul.f32 %v971_v34, %v892_v56 }
  0xe4   :  { %v896_v5 = vsel %vm895_vm0, %v892_v56, %v894_v10 }
  0xe5   :  { %v899_v15 = vsel %vm897_vm1, %v898_v36, %v896_v5 }
  0xe6   :  { %900 = vst [vmem:[%s1884_s1] sm:$0x1] %v899_v15 }

</bundles_post_ra>
